<compile_context>
chip_gen: v7x
topology: tpu7x:2x2x1
jax: 0.10.0
libtpu: 0.0.40
codegen_flags: <defaults>
</compile_context>

<pallas_src>
import jax
import jax.numpy as jnp
import numpy as np
from jax.experimental import pallas as pl
from jax.experimental.pallas import tpu as pltpu


def _make_kernel(fold_scale_into_x: bool):
    """Build the Lidb kernel body. `fold_scale_into_x` is a static tiling decision."""

    def kernel(xc_ref,     # (tile_b, tile_in)  bf16 : x tile
               u_ref,      # (tile_in, b_dim)   f32  : alpha * (x @ Aaux @ (Atrain @ Btrain)) tile
               w_ref,      # (out_pad, tile_in) bf16 : linear.weight tile (zero-padded rows)
               bauxT_ref,  # (out_pad, b_dim)   f32  : Baux^T (zero-padded rows)
               m_ref,      # (1, tile_in)       f32
               bias_ref,   # (1, out_pad)       f32
               o_ref):     # (tile_b, out_pad)  f32  : output block (resident across k)
        k = pl.program_id(1)

        @pl.when(k == 0)
        def _():
            o_ref[...] = jnp.zeros_like(o_ref)

        # lora_weight.T tile, straight off the MXU in (Out_pad, tile_in) orientation.
        lora_t = jax.lax.dot_general(
            bauxT_ref[...], u_ref[...],
            (((1,), (1,)), ((), ())),
            preferred_element_type=jnp.float32)                     # (out_pad, tile_in)

        # Norm-critical math in f32 (review correctness note).
        combined = w_ref[...].astype(jnp.float32) + lora_t          # (out_pad, tile_in)

        # Per-In-column scale = m * rsqrt(sum_over_Out combined^2). Out is untiled,
        # so each column's norm is complete within this tile. Zero padded rows of W
        # and Baux^T do not perturb the norm.
        sumsq = jnp.sum(combined * combined, axis=0, keepdims=True)  # (1, tile_in)
        scale = m_ref[...] * jax.lax.rsqrt(sumsq)                    # (1, tile_in)

        # Fold the scale into the smaller operand instead of materializing m * V.
        if fold_scale_into_x:
            xs = xc_ref[...].astype(jnp.float32) * scale             # (tile_b, tile_in)
            partial = jax.lax.dot_general(
                xs, combined, (((1,), (1,)), ((), ())),
                preferred_element_type=jnp.float32)                  # (tile_b, out_pad)
        else:
            cs = combined * scale                                    # (out_pad, tile_in)
            partial = jax.lax.dot_general(
                xc_ref[...].astype(jnp.float32), cs,
                (((1,), (1,)), ((), ())),
                preferred_element_type=jnp.float32)                  # (tile_b, out_pad)

        o_ref[...] += partial

        @pl.when(k == pl.num_programs(1) - 1)
        def _():
            o_ref[...] += bias_ref[...]

    return kernel


def _pick_tiles(batch, in_features, out_pad, b_dim, vmem_budget_bytes):
    """Largest MXU/lane-friendly tiles whose per-step footprint fits the VMEM budget."""
    ti_opts = [t for t in (512, 256, 128) if in_features % t == 0] or [in_features]
    tb_opts = [t for t in (512, 256, 128) if batch % t == 0] or [batch]

    def footprint(tb, ti):
        x_bytes = 2 * tb * ti * 2            # bf16, double-buffered
        w_bytes = 2 * out_pad * ti * 2       # bf16, double-buffered
        u_bytes = 2 * ti * b_dim * 4
        o_bytes = 2 * tb * out_pad * 4       # f32 output block
        small = 2 * (out_pad * b_dim * 4 + out_pad * 4 + ti * 4)
        return x_bytes + w_bytes + u_bytes + o_bytes + small

    for ti in ti_opts:
        for tb in tb_opts:
            if footprint(tb, ti) <= vmem_budget_bytes:
                return tb, ti
    return tb_opts[-1], ti_opts[-1]


def lidb_forward(x, w, bias, aaux, atrain, btrain, baux, m, alpha):
    """Pallas forward pass of Lidb. Requires batch == in_features (module semantics)."""
    batch, in_features = x.shape
    out_features = w.shape[0]
    if batch != in_features:
        raise ValueError(
            f"Lidb adds lora_weight.T of shape ({out_features}, {batch}) to the "
            f"({out_features}, {in_features}) weight; batch must equal in_features.")

    b_dim = baux.shape[0]
    f32 = jnp.float32
    bf16 = jnp.bfloat16

    LANE = 128
    out_pad = ((out_features + LANE - 1) // LANE) * LANE

    # --- Wrapper-side precompute (hoisted out of the grid loop) -----------------
    # Low-rank left factor with alpha folded in: (In, b_dim), tiny. Kept in f32.
    xf = x.astype(f32)
    u_full = alpha * (xf @ (aaux.astype(f32) @ (atrain.astype(f32) @ btrain.astype(f32))))

    # Zero-pad the Out axis (norm-safe; padded output columns stay zero and are sliced off)
    # and pre-transpose the tiny Baux so the kernel never performs an explicit transpose.
    w_p = jnp.zeros((out_pad, in_features), bf16).at[:out_features, :].set(w.astype(bf16))
    bias_p = jnp.zeros((1, out_pad), f32).at[0, :out_features].set(
        bias.astype(f32).reshape(-1))
    baux_t = jnp.zeros((out_pad, b_dim), f32).at[:out_features, :].set(baux.astype(f32).T)
    m_row = m.astype(f32).reshape(1, in_features)

    # --- VMEM-aware tiling + explicit scoped-VMEM limit -------------------------
    try:
        vmem_cap = pltpu.get_tpu_info().vmem_capacity_bytes
    except Exception:
        vmem_cap = 64 * 1024 * 1024  # conservative (v7x per-TC)
    vmem_limit = int(min(vmem_cap // 2, 96 * 1024 * 1024))
    tile_b, tile_in = _pick_tiles(batch, in_features, out_pad, b_dim,
                                  int(vmem_limit * 0.8))
    n_b = batch // tile_b
    n_k = in_features // tile_in
    fold_scale_into_x = tile_b <= out_pad

    kernel = _make_kernel(fold_scale_into_x)

    out = pl.pallas_call(
        kernel,
        out_shape=jax.ShapeDtypeStruct((batch, out_pad), f32),
        grid=(n_b, n_k),
        in_specs=[
            pl.BlockSpec((tile_b, tile_in), lambda b, k: (b, k)),      # x (bf16)
            pl.BlockSpec((tile_in, b_dim), lambda b, k: (k, 0)),       # u = alpha*x@Aaux@(At@Bt)
            pl.BlockSpec((out_pad, tile_in), lambda b, k: (0, k)),     # W (bf16, padded)
            pl.BlockSpec((out_pad, b_dim), lambda b, k: (0, 0)),       # Baux^T (padded)
            pl.BlockSpec((1, tile_in), lambda b, k: (0, k)),           # m
            pl.BlockSpec((1, out_pad), lambda b, k: (0, 0)),           # bias (padded)
        ],
        out_specs=pl.BlockSpec((tile_b, out_pad), lambda b, k: (b, 0)),
        compiler_params=pltpu.CompilerParams(
            dimension_semantics=("parallel", "arbitrary"),  # B parallel (v7x megacore), In reduction
            vmem_limit_bytes=vmem_limit),
    )(x.astype(bf16), u_full, w_p, baux_t, m_row, bias_p)

    return out[:, :out_features]


def _reference_f64(x, w, bias, aaux, atrain, btrain, baux, m, alpha):
    # Ground truth in float64 numpy, following the PyTorch forward verbatim.
    x, w, bias, aaux, atrain, btrain, baux, m = (
        np.asarray(a, dtype=np.float64)
        for a in (x, w, bias, aaux, atrain, btrain, baux, m))
    A = aaux @ (atrain @ btrain) @ baux
    lora_weight = x @ A
    combined = w + alpha * lora_weight.T
    col_norm = np.linalg.norm(combined, axis=0, keepdims=True)
    v = combined / col_norm
    new_w = m * v
    return x @ new_w.T + bias.reshape(1, -1)


if __name__ == "__main__":
    # Small shapes consistent with the module; batch == in_features so the
    # W + alpha * lora_weight.T addition is exactly element-wise (as in PyTorch).
    in_features = 32
    out_features = 16
    lora_dim = 4
    a_dim = 8
    b_dim = 8
    alpha = 0.5
    batch = in_features  # 32

    key = jax.random.PRNGKey(0)
    kx, kw, kb, ka, kat, kbt, kbx = jax.random.split(key, 7)

    x = jax.random.normal(kx, (batch, in_features), dtype=jnp.float32)
    w = jax.random.normal(kw, (out_features, in_features), dtype=jnp.float32) * 0.1
    bias = jax.random.normal(kb, (out_features,), dtype=jnp.float32) * 0.1

    aaux = jax.random.normal(ka, (in_features, a_dim), dtype=jnp.float32)
    atrain = jax.random.normal(kat, (a_dim, lora_dim), dtype=jnp.float32)
    btrain = jax.random.normal(kbt, (lora_dim, b_dim), dtype=jnp.float32)
    baux = jax.random.normal(kbx, (b_dim, out_features), dtype=jnp.float32)

    # m = ||linear.weight||_2 along dim 0, keepdim -> (1, in_features)
    m = jnp.sqrt(jnp.sum(w * w, axis=0, keepdims=True))

    out = lidb_forward(x, w, bias, aaux, atrain, btrain, baux, m, alpha)
    out = jax.block_until_ready(out)
    assert out.shape == (batch, out_features)

    ref = _reference_f64(x, w, bias, aaux, atrain, btrain, baux, m, alpha)
    out_np = np.asarray(out, dtype=np.float64)
    rel_err = np.linalg.norm(out_np - ref) / np.linalg.norm(ref)
    # Tolerance accounts for bf16 x/W streams and MXU bf16-pass precision on f32 operands.
    assert rel_err < 2e-2, f"relative error vs float64 reference too large: {rel_err}"

    print("KERNEL_OK")
</pallas_src>

<mosaic_0001>
module attributes {stable_mosaic.version = 11 : i64} {
  func.func @kernel(%arg0: i32, %arg1: i32, %arg2: memref<32x32xbf16, #tpu.memory_space<vmem>>, %arg3: memref<32x8xf32, #tpu.memory_space<vmem>>, %arg4: memref<128x32xbf16, #tpu.memory_space<vmem>>, %arg5: memref<128x8xf32, #tpu.memory_space<vmem>>, %arg6: memref<1x32xf32, #tpu.memory_space<vmem>>, %arg7: memref<1x128xf32, #tpu.memory_space<vmem>>, %arg8: memref<32x128xf32, #tpu.memory_space<vmem>>) attributes {dimension_semantics = [#tpu.dimension_semantics<parallel>, #tpu.dimension_semantics<arbitrary>], iteration_bounds = array<i64: 1, 1>, scalar_prefetch = 0 : i64, scratch_operands = 0 : i64, tpu.core_type = #tpu.core_type<tc>, window_params = [{transform_indices = @transform_0, window_bounds = array<i64: 32, 32>}, {transform_indices = @transform_1, window_bounds = array<i64: 32, 8>}, {transform_indices = @transform_2, window_bounds = array<i64: 128, 32>}, {pipeline_mode = #tpu.pipeline_mode<synchronous>, transform_indices = @transform_3, window_bounds = array<i64: 128, 8>}, {transform_indices = @transform_4, window_bounds = array<i64: 1, 32>}, {pipeline_mode = #tpu.pipeline_mode<synchronous>, transform_indices = @transform_5, window_bounds = array<i64: 1, 128>}, {transform_indices = @transform_6, window_bounds = array<i64: 32, 128>}]} {
    %c0_i32 = arith.constant 0 : i32
    %0 = arith.cmpi eq, %arg1, %c0_i32 : i32
    %1 = arith.extui %0 : i1 to i32
    %c0_i32_0 = arith.constant 0 : i32
    %2 = arith.cmpi ne, %1, %c0_i32_0 : i32
    scf.if %2 {
      %cst_18 = arith.constant 0.000000e+00 : f32
      %26 = vector.broadcast %cst_18 : f32 to vector<32x128xf32>
      %c0_19 = arith.constant 0 : index
      %c0_20 = arith.constant 0 : index
      %27 = vector.load %arg8[%c0_19, %c0_20] : memref<32x128xf32, #tpu.memory_space<vmem>>, vector<32x128xf32>
      tpu.vector_store %arg8[%c0_19, %c0_20], %26 {strides = array<i32>} : memref<32x128xf32, #tpu.memory_space<vmem>>, vector<32x128xf32>,
    } else {
    }
    %c0 = arith.constant 0 : index
    %c0_1 = arith.constant 0 : index
    %3 = vector.load %arg5[%c0, %c0_1] : memref<128x8xf32, #tpu.memory_space<vmem>>, vector<128x8xf32>
    %c0_2 = arith.constant 0 : index
    %c0_3 = arith.constant 0 : index
    %4 = vector.load %arg3[%c0_2, %c0_3] : memref<32x8xf32, #tpu.memory_space<vmem>>, vector<32x8xf32>
    %cst = arith.constant dense<0.000000e+00> : vector<128x32xf32>
    %5 = tpu.matmul %3, %4, %cst {dimension_numbers = #tpu.dot_dimension_numbers<[1], [1], [0], [0], [0, 0, 1, 0], [], []>} : vector<128x8xf32>, vector<32x8xf32>, vector<128x32xf32> -> vector<128x32xf32>
    %c0_4 = arith.constant 0 : index
    %c0_5 = arith.constant 0 : index
    %6 = vector.load %arg4[%c0_4, %c0_5] : memref<128x32xbf16, #tpu.memory_space<vmem>>, vector<128x32xbf16>
    %7 = arith.extf %6 : vector<128x32xbf16> to vector<128x32xf32>
    %8 = arith.addf %7, %5 : vector<128x32xf32>
    %9 = arith.mulf %8, %8 : vector<128x32xf32>
    %cst_6 = arith.constant dense<0.000000e+00> : vector<32xf32>
    %10 = vector.multi_reduction <add>, %9, %cst_6 [0] : vector<128x32xf32> to vector<32xf32>
    %11 = vector.shape_cast %10 : vector<32xf32> to vector<1x32xf32>
    %c0_7 = arith.constant 0 : index
    %c0_8 = arith.constant 0 : index
    %12 = vector.load %arg6[%c0_7, %c0_8] : memref<1x32xf32, #tpu.memory_space<vmem>>, vector<1x32xf32>
    %13 = math.rsqrt %11 : vector<1x32xf32>
    %14 = arith.mulf %12, %13 : vector<1x32xf32>
    %c0_9 = arith.constant 0 : index
    %c0_10 = arith.constant 0 : index
    %15 = vector.load %arg2[%c0_9, %c0_10] : memref<32x32xbf16, #tpu.memory_space<vmem>>, vector<32x32xbf16>
    %16 = arith.extf %15 : vector<32x32xbf16> to vector<32x32xf32>
    %17 = vector.broadcast %14 : vector<1x32xf32> to vector<32x32xf32>
    %18 = arith.mulf %16, %17 : vector<32x32xf32>
    %cst_11 = arith.constant dense<0.000000e+00> : vector<32x128xf32>
    %19 = tpu.matmul %18, %8, %cst_11 {dimension_numbers = #tpu.dot_dimension_numbers<[1], [1], [0], [0], [0, 0, 1, 0], [], []>} : vector<32x32xf32>, vector<128x32xf32>, vector<32x128xf32> -> vector<32x128xf32>
    %c0_12 = arith.constant 0 : index
    %c0_13 = arith.constant 0 : index
    %20 = vector.load %arg8[%c0_12, %c0_13] : memref<32x128xf32, #tpu.memory_space<vmem>>, vector<32x128xf32>
    %21 = arith.addf %20, %19 : vector<32x128xf32>
    %c0_14 = arith.constant 0 : index
    %c0_15 = arith.constant 0 : index
    %22 = vector.load %arg8[%c0_14, %c0_15] : memref<32x128xf32, #tpu.memory_space<vmem>>, vector<32x128xf32>
    tpu.vector_store %arg8[%c0_14, %c0_15], %21 {strides = array<i32>} : memref<32x128xf32, #tpu.memory_space<vmem>>, vector<32x128xf32>,
    %c0_i32_16 = arith.constant 0 : i32
    %23 = arith.cmpi eq, %arg1, %c0_i32_16 : i32
    %24 = arith.extui %23 : i1 to i32
    %c0_i32_17 = arith.constant 0 : i32
    %25 = arith.cmpi ne, %24, %c0_i32_17 : i32
    scf.if %25 {
      %c0_18 = arith.constant 0 : index
      %c0_19 = arith.constant 0 : index
      %26 = vector.load %arg8[%c0_18, %c0_19] : memref<32x128xf32, #tpu.memory_space<vmem>>, vector<32x128xf32>
      %c0_20 = arith.constant 0 : index
      %c0_21 = arith.constant 0 : index
      %27 = vector.load %arg7[%c0_20, %c0_21] : memref<1x128xf32, #tpu.memory_space<vmem>>, vector<1x128xf32>
      %28 = vector.broadcast %27 : vector<1x128xf32> to vector<32x128xf32>
      %29 = arith.addf %26, %28 : vector<32x128xf32>
      %c0_22 = arith.constant 0 : index
      %c0_23 = arith.constant 0 : index
      %30 = vector.load %arg8[%c0_22, %c0_23] : memref<32x128xf32, #tpu.memory_space<vmem>>, vector<32x128xf32>
      tpu.vector_store %arg8[%c0_22, %c0_23], %29 {strides = array<i32>} : memref<32x128xf32, #tpu.memory_space<vmem>>, vector<32x128xf32>,
    } else {
    }
    return
  }
  func.func @transform_0(%arg0: i32, %arg1: i32) -> (i32, i32) {
    %c0_i32 = arith.constant 0 : i32
    return %arg0, %arg1 : i32, i32
  }
  func.func @transform_1(%arg0: i32, %arg1: i32) -> (i32, i32) {
    %c0_i32 = arith.constant 0 : i32
    %c0_i32_0 = arith.constant 0 : i32
    return %arg1, %c0_i32 : i32, i32
  }
  func.func @transform_2(%arg0: i32, %arg1: i32) -> (i32, i32) {
    %c0_i32 = arith.constant 0 : i32
    %c0_i32_0 = arith.constant 0 : i32
    return %c0_i32, %arg1 : i32, i32
  }
  func.func @transform_3(%arg0: i32, %arg1: i32) -> (i32, i32) {
    %c0_i32 = arith.constant 0 : i32
    %c0_i32_0 = arith.constant 0 : i32
    %c0_i32_1 = arith.constant 0 : i32
    return %c0_i32, %c0_i32_0 : i32, i32
  }
  func.func @transform_4(%arg0: i32, %arg1: i32) -> (i32, i32) {
    %c0_i32 = arith.constant 0 : i32
    %c0_i32_0 = arith.constant 0 : i32
    return %c0_i32, %arg1 : i32, i32
  }
  func.func @transform_5(%arg0: i32, %arg1: i32) -> (i32, i32) {
    %c0_i32 = arith.constant 0 : i32
    %c0_i32_0 = arith.constant 0 : i32
    %c0_i32_1 = arith.constant 0 : i32
    return %c0_i32, %c0_i32_0 : i32, i32
  }
  func.func @transform_6(%arg0: i32, %arg1: i32) -> (i32, i32) {
    %c0_i32 = arith.constant 0 : i32
    %c0_i32_0 = arith.constant 0 : i32
    return %arg0, %c0_i32 : i32, i32
  }
}

</mosaic_0001>

<bundles_post_ra>
// kernel: tpu_custom_call.1
= control target key start
LH: loop header
LB: loop body
LE: loop exit
PB: predicated region body
PF: predicated region fallthrough
CT: control target
= control target key end

     0   :  { %vm52_vm0 = vcmask 64512   ;;  %s1087_s0 = inlined_call_operand.vmem [shape: bf16[32,32], index: 0, kind: input, shape index: {}]   ;;  %s1088_s1 = inlined_call_operand.vmem [shape: f32[32,8], index: 1, kind: input, shape index: {}]   ;;  %s1089_s2 = inlined_call_operand.vmem [shape: bf16[128,32], index: 2, kind: input, shape index: {}]   ;;  %s1090_s3 = inlined_call_operand.vmem [shape: f32[128,8], index: 3, kind: input, shape index: {}]   ;;  %s1091_s4 = inlined_call_operand.vmem [shape: f32[1,32], index: 4, kind: input, shape index: {}]   ;;  %s1092_s5 = inlined_call_operand.vmem [shape: f32[1,128], index: 5, kind: input, shape index: {}]   ;;  %s1093_s6 = inlined_call_operand.hbm [shape: f32[32,128], index: 6, kind: output, shape index: {}]  }
   0x1   :  { %v48_v0 = vld [vmem:[%s1088_s1] sm:$0xff]  ;;  %v49_v1 = vld [vmem:[%s1088_s1 + $0x8] sm:$0xff]  ;;  %v50_v2 = vld [vmem:[%s1088_s1 + $0x10] sm:$0xff] }
   0x2   :  { %v775_v3 = vpack.c.bf16 %v49_v1, %v48_v0  ;;  %vm776_vm1 = vmpackc.low %vm52_vm0, %vm52_vm0  ;;  %v51_v4 = vld [vmem:[%s1088_s1 + $0x18] sm:$0xff]  ;;  %v32_v5 = vld [vmem:[%s1090_s3] sm:$0xff] }
   0x3   :  { %v781_v6 = vpack.c.bf16 %v51_v4, %v50_v2  ;;  %713 = vmatprep.mubr.msk.f32.mxu0 %vm52_vm0, %v32_v5 }
   0x4   :  { %777 = vmatprep.subr.msk.bf16.mxu0 %vm776_vm1, %v775_v3 }
   0x5   :  { %780 = vmatpush3.bf16.xpose.msk.msra.mxu0 %vm776_vm1, %v775_v3 }
   0x6   :  { %783 = vmatprep.subr.msk.bf16.mxu0 %vm776_vm1, %v781_v6 }
   0x7   :  { %11 = vsyncpa [#allocation3], 0  ;;  %v33_v7 = vld [vmem:[%s1090_s3 + $0x8] sm:$0xff]  ;;  %v34_v8 = vld [vmem:[%s1090_s3 + $0x10] sm:$0xff]  ;;  %vm322_vm2 = vcmask 261120   ;;  %s865_s7 = smov [#allocation2]  }
   0x8   :  { %v35_v9 = vld [vmem:[%s1090_s3 + $0x18] sm:$0xff]  ;;  %v36_v10 = vld [vmem:[%s1090_s3 + $0x20] sm:$0xff]  ;;  %v37_v11 = vld [vmem:[%s1090_s3 + $0x28] sm:$0xff]  ;;  %s565_s8 = sshll.u32 %s865_s7, 4  ;;  %s566_s8 = int_to_ptr.vmem [resolvable:$true] %s565_s8 }
   0x9   :  { %v38_v12 = vld [vmem:[%s1090_s3 + $0x30] sm:$0xff]  ;;  %v39_v13 = vld [vmem:[%s1090_s3 + $0x38] sm:$0xff]  ;;  %v40_v14 = vld [vmem:[%s1090_s3 + $0x40] sm:$0xff]  ;;  %s841_s9 = scalar_lea.vmem %s566_s8, 512  ;;  %p846_p1 = scmp.lt.s32.totalorder %s566_s8, %s566_s8 }
   0xa   :  { %v41_v15 = vld [vmem:[%s1090_s3 + $0x48] sm:$0xff]  ;;  %v42_v16 = vld [vmem:[%s1090_s3 + $0x50] sm:$0xff]  ;;  %v43_v17 = vld [vmem:[%s1090_s3 + $0x58] sm:$0xff]  ;;  %p842_p0 = scmp.ne.s32.totalorder %s566_s8, %s841_s9  ;;  %p847_p2 = scmp.lt.s32.totalorder %s841_s9, %s841_s9 }
   0xb   :  { %v44_v18 = vld [vmem:[%s1090_s3 + $0x60] sm:$0xff]  ;;  %v45_v19 = vld [vmem:[%s1090_s3 + $0x68] sm:$0xff]  ;;  %v46_v20 = vld [vmem:[%s1090_s3 + $0x70] sm:$0xff] }
   0xc   :  { %v47_v21 = vld [vmem:[%s1090_s3 + $0x78] sm:$0xff]  ;;  %v618_v22 = vld [vmem:[%s1089_s2] sm:$0xff]   ;;  %v657_v25 = vld [vmem:[%s1089_s2 + $0x8] sm:$0xff]   ;;  %p848_p3 = por %p847_p2, %p846_p1 }
   0xd   :  { %786 = vmatpush3.bf16.xpose.msk.msra.mxu0 %vm776_vm1, %v781_v6  ;;  %v620_v23 = vunpack.c.h.bf16 %v618_v22  ;;  %v619_v24 = vunpack.c.l.bf16 %v618_v22  ;;  %v624_v29 = vunpack.c.h.bf16 %v657_v25  ;;  %v623_v31 = vunpack.c.l.bf16 %v657_v25  ;;  %v658_v32 = vld [vmem:[%s1089_s2 + $0x10] sm:$0xff]   ;;  %vm992_vm3 = vmpackc.low %vm322_vm2, %vm322_vm2  ;;  %v659_v45 = vld [vmem:[%s1089_s2 + $0x18] sm:$0xff]  }
   0xe   :  { %v628_v41 = vunpack.c.h.bf16 %v658_v32  ;;  %v627_v44 = vunpack.c.l.bf16 %v658_v32  ;;  %v632_v53 = vunpack.c.h.bf16 %v659_v45  ;;  %v631_v56 = vunpack.c.l.bf16 %v659_v45  ;;  %v660_v57 = vld [vmem:[%s1089_s2 + $0x20] sm:$0xff]   ;;  %p849_p4 = pnand %p848_p3, %p842_p0 }
   0xf   :  { %v636_v3 = vunpack.c.h.bf16 %v660_v57  ;;  %v635_v6 = vunpack.c.l.bf16 %v660_v57  ;;  %v616_v34 = vld [vmem:[%s1092_s5] ss:$0 sm:$0xff] }
  0x14   :  { %714 = vmatmul.mubr.msk.f32.vlgmr.msra.gmra.mrb[0].mxu0 %vm52_vm0, %v33_v7  ;;  %v661_v7 = vld [vmem:[%s1089_s2 + $0x28] sm:$0xff]  }
  0x15   :  { %716 = vmatprep.mubr.msk.f32.mxu0 %vm52_vm0, %v34_v8 }
  0x18   :  { %717 = vmatmul.mubr.msk.f32.gmra.mrb[2].mxu0 %vm52_vm0, %v35_v9 }
  0x19   :  { %719 = vmatprep.mubr.msk.f32.mxu0 %vm52_vm0, %v36_v10 }
  0x1c   :  { %720 = vmatmul.mubr.msk.f32.gmra.mrb[4].mxu0 %vm52_vm0, %v37_v11 }
  0x1d   :  { %722 = vmatprep.mubr.msk.f32.mxu0 %vm52_vm0, %v38_v12 }
  0x20   :  { %723 = vmatmul.mubr.msk.f32.gmra.mrb[6].mxu0 %vm52_vm0, %v39_v13 }
  0x21   :  { %725 = vmatprep.mubr.msk.f32.mxu0 %vm52_vm0, %v40_v14 }
  0x24   :  { %726 = vmatmul.mubr.msk.f32.gmra.mrb[8].mxu0 %vm52_vm0, %v41_v15 }
  0x25   :  { %728 = vmatprep.mubr.msk.f32.mxu0 %vm52_vm0, %v42_v16 }
  0x28   :  { %729 = vmatmul.mubr.msk.f32.gmra.mrb[10].mxu0 %vm52_vm0, %v43_v17  ;;  %v640_v17 = vunpack.c.h.bf16 %v661_v7 }
  0x29   :  { %731 = vmatprep.mubr.msk.f32.mxu0 %vm52_vm0, %v44_v18 }
  0x2c   :  { %732 = vmatmul.mubr.msk.f32.gmra.mrb[12].mxu0 %vm52_vm0, %v45_v19 }
  0x2d   :  { %734 = vmatprep.mubr.msk.f32.mxu0 %vm52_vm0, %v46_v20  ;;  %v639_v20 = vunpack.c.l.bf16 %v661_v7 }
  0x30   :  { %735 = vmatmul.mubr.msk.f32.gmra.mrb[14].mxu0 %vm52_vm0, %v47_v21  ;;  %v662_v21 = vld [vmem:[%s1089_s2 + $0x30] sm:$0xff]  }
  0xe7   :  { %v715_v26 = vpop.f32.mrb[0].mxu0 }
  0xe8   :  { %v291_v27 = vadd.f32 %v715_v26, %v620_v23  ;;  %v179_v28 = vpop.f32.mrb[1].mxu0 }
  0xe9   :  { %v290_v30 = vadd.f32 %v619_v24, %v179_v28 }
  0xea   :  { %v307_v33 = vmul.f32 %v291_v27, %v291_v27 }
  0xeb   :  { %v306_v35 = vmul.f32 %v290_v30, %v290_v30  ;;  %v718_v36 = vpop.f32.mrb[2].mxu0  ;;  %v787_v37 = vpack.c.bf16 %v291_v27, %v290_v30 }
  0xec   :  { %v324_v38 = vsel %vm322_vm2, %v307_v33, 0.0  ;;  %v293_v39 = vadd.f32 %v718_v36, %v624_v29  ;;  %v189_v40 = vpop.f32.mrb[3].mxu0  ;;  %v663_v36 = vld [vmem:[%s1089_s2 + $0x38] sm:$0xff]  }
  0xed   :  { %v323_v42 = vsel %vm322_vm2, %v306_v35, 0.0  ;;  %v292_v43 = vadd.f32 %v623_v31, %v189_v40  ;;  %789 = vmatprep.subr.msk.bf16.mxu1 %vm992_vm3, %v787_v37  ;;  %v644_v31 = vunpack.c.h.bf16 %v662_v21  ;;  %v643_v35 = vunpack.c.l.bf16 %v662_v21  ;;  %v664_v21 = vld [vmem:[%s1087_s0 + $0x8] sm:$0xff]  }
  0xee   :  { %v325_v46 = vadd.f32 %v324_v38, %v323_v42  ;;  %792 = vmatpush3.bf16.xpose.msk.msra.mxu1 %vm992_vm3, %v787_v37  ;;  %v309_v47 = vmul.f32 %v293_v39, %v293_v39 }
  0xef   :  { %v308_v48 = vmul.f32 %v292_v43, %v292_v43  ;;  %v793_v49 = vpack.c.bf16 %v293_v39, %v292_v43  ;;  %v721_v50 = vpop.f32.mrb[4].mxu0 }
  0xf0   :  { %v295_v51 = vadd.f32 %v721_v50, %v628_v41  ;;  %v199_v52 = vpop.f32.mrb[5].mxu0  ;;  %v328_v59 = vsel %vm322_vm2, %v309_v47, 0.0 }
  0xf1   :  { %v326_v54 = vsel %vm322_vm2, %v308_v48, 0.0  ;;  %v294_v55 = vadd.f32 %v627_v44, %v199_v52  ;;  %795 = vmatprep.subr.msk.bf16.mxu1 %vm992_vm3, %v793_v49 }
  0xf2   :  { %v327_v58 = vadd.f32 %v326_v54, %v325_v46  ;;  %v311_v60 = vmul.f32 %v295_v51, %v295_v51  ;;  %v648_v46 = vunpack.c.h.bf16 %v663_v36 }
  0xf3   :  { %v310_v61 = vmul.f32 %v294_v55, %v294_v55  ;;  %v799_v62 = vpack.c.bf16 %v295_v51, %v294_v55  ;;  %v724_v63 = vpop.f32.mrb[6].mxu0 }
  0xf4   :  { %v329_v0 = vadd.f32 %v328_v59, %v327_v58  ;;  %v297_v1 = vadd.f32 %v724_v63, %v632_v53  ;;  %v209_v2 = vpop.f32.mrb[7].mxu0  ;;  %v332_v9 = vsel %vm322_vm2, %v311_v60, 0.0 }
  0xf5   :  { %v330_v4 = vsel %vm322_vm2, %v310_v61, 0.0  ;;  %v296_v5 = vadd.f32 %v631_v56, %v209_v2 }
  0xf6   :  { %v331_v8 = vadd.f32 %v330_v4, %v329_v0  ;;  %798 = vmatpush3.bf16.xpose.msk.msra.mxu1 %vm992_vm3, %v793_v49  ;;  %v313_v10 = vmul.f32 %v297_v1, %v297_v1  ;;  %v647_v49 = vunpack.c.l.bf16 %v663_v36 }
  0xf7   :  { %v312_v11 = vmul.f32 %v296_v5, %v296_v5  ;;  %v805_v12 = vpack.c.bf16 %v297_v1, %v296_v5  ;;  %v727_v13 = vpop.f32.mrb[8].mxu0  ;;  %801 = vmatprep.subr.msk.bf16.mxu1 %vm992_vm3, %v799_v62 }
  0xf8   :  { %v333_v14 = vadd.f32 %v332_v9, %v331_v8  ;;  %v299_v15 = vadd.f32 %v727_v13, %v636_v3  ;;  %v219_v16 = vpop.f32.mrb[9].mxu0  ;;  %v336_v23 = vsel %vm322_vm2, %v313_v10, 0.0  ;;  %v372_v13 = vlaneseq }
  0xf9   :  { %v334_v18 = vsel %vm322_vm2, %v312_v11, 0.0  ;;  %v298_v19 = vadd.f32 %v635_v6, %v219_v16  ;;  %v650_v16 = vld [vmem:[%s1087_s0] sm:$0xff]  }
  0xfa   :  { %v335_v22 = vadd.f32 %v334_v18, %v333_v14  ;;  %v315_v24 = vmul.f32 %v299_v15, %v299_v15  ;;  %v373_v14 = vshrl.u32 %v372_v13, 7 }
  0xfb   :  { %v314_v25 = vmul.f32 %v298_v19, %v298_v19  ;;  %v811_v26 = vpack.c.bf16 %v299_v15, %v298_v19  ;;  %v730_v27 = vpop.f32.mrb[10].mxu0  ;;  %v360_v15 = vld [vmem:[%s1091_s4] sm:$0x1] }
  0xfc   :  { %v337_v28 = vadd.f32 %v336_v23, %v335_v22  ;;  %v301_v29 = vadd.f32 %v730_v27, %v640_v17  ;;  %v229_v30 = vpop.f32.mrb[11].mxu0  ;;  %v340_v38 = vsel %vm322_vm2, %v315_v24, 0.0  ;;  %v374_v17 = vsub.s32 0, %v373_v14 }
  0xfd   :  { %v338_v32 = vsel %vm322_vm2, %v314_v25, 0.0  ;;  %v300_v33 = vadd.f32 %v639_v20, %v229_v30  ;;  %v651_v20 = vunpack.c.l.bf16 %v650_v16  ;;  %v652_v22 = vunpack.c.h.bf16 %v650_v16 }
  0xfe   :  { %v339_v37 = vadd.f32 %v338_v32, %v337_v28  ;;  %804 = vmatpush3.bf16.xpose.msk.msra.mxu1 %vm992_vm3, %v799_v62  ;;  %v317_v39 = vmul.f32 %v301_v29, %v301_v29  ;;  %v655_v24 = vunpack.c.l.bf16 %v664_v21  ;;  %v656_v27 = vunpack.c.h.bf16 %v664_v21 }
  0xff   :  { %v316_v40 = vmul.f32 %v300_v33, %v300_v33  ;;  %v817_v41 = vpack.c.bf16 %v301_v29, %v300_v33  ;;  %v733_v42 = vpop.f32.mrb[12].mxu0  ;;  %807 = vmatprep.subr.msk.bf16.mxu1 %vm992_vm3, %v805_v12 }
 0x100   :  { %v341_v43 = vadd.f32 %v340_v38, %v339_v37  ;;  %v303_v44 = vadd.f32 %v733_v42, %v644_v31  ;;  %v239_v45 = vpop.f32.mrb[13].mxu0  ;;  %v344_v51 = vsel %vm322_vm2, %v317_v39, 0.0 }
 0x101   :  { %v342_v47 = vsel %vm322_vm2, %v316_v40, 0.0  ;;  %v302_v48 = vadd.f32 %v643_v35, %v239_v45 }
 0x102   :  { %v343_v50 = vadd.f32 %v342_v47, %v341_v43  ;;  %v319_v52 = vmul.f32 %v303_v44, %v303_v44 }
 0x103   :  { %v318_v53 = vmul.f32 %v302_v48, %v302_v48  ;;  %v823_v54 = vpack.c.bf16 %v303_v44, %v302_v48  ;;  %v736_v55 = vpop.f32.mrb[14].mxu0 }
 0x104   :  { %v345_v56 = vadd.f32 %v344_v51, %v343_v50  ;;  %v305_v57 = vadd.f32 %v736_v55, %v648_v46  ;;  %v249_v58 = vpop.f32.mrb[15].mxu0  ;;  %v348_v62 = vsel %vm322_vm2, %v319_v52, 0.0 }
 0x105   :  { %v346_v59 = vsel %vm322_vm2, %v318_v53, 0.0  ;;  %v304_v60 = vadd.f32 %v647_v49, %v249_v58 }
 0x106   :  { %v347_v61 = vadd.f32 %v346_v59, %v345_v56  ;;  %810 = vmatpush3.bf16.xpose.msk.msra.mxu1 %vm992_vm3, %v805_v12  ;;  %v321_v63 = vmul.f32 %v305_v57, %v305_v57 }
 0x107   :  { %v320_v0 = vmul.f32 %v304_v60, %v304_v60  ;;  %v829_v1 = vpack.c.bf16 %v305_v57, %v304_v60  ;;  %813 = vmatprep.subr.msk.bf16.mxu1 %vm992_vm3, %v811_v26 }
 0x108   :  { %v349_v2 = vadd.f32 %v348_v62, %v347_v61  ;;  %v352_v5 = vsel %vm322_vm2, %v321_v63, 0.0 }
 0x109   :  { %v350_v3 = vsel %vm322_vm2, %v320_v0, 0.0 }
 0x10a   :  { %v351_v4 = vadd.f32 %v350_v3, %v349_v2 }
 0x10c   :  { %v353_v6 = vadd.f32 %v352_v5, %v351_v4 }
 0x10e   :  { %v354_v7 = vrot.slane %v353_v6, 4  ;;  %816 = vmatpush3.bf16.xpose.msk.msra.mxu1 %vm992_vm3, %v811_v26 }
 0x10f   :  { %819 = vmatprep.subr.msk.bf16.mxu1 %vm992_vm3, %v817_v41 }
 0x110   :  { %v355_v8 = vadd.f32 %v354_v7, %v353_v6 }
 0x112   :  { %v356_v9 = vrot.slane %v355_v8, 2 }
 0x114   :  { %v357_v10 = vadd.f32 %v356_v9, %v355_v8 }
 0x116   :  { %v358_v11 = vrot.slane %v357_v10, 1  ;;  %822 = vmatpush3.bf16.xpose.msk.msra.mxu1 %vm992_vm3, %v817_v41 }
 0x117   :  { %825 = vmatprep.subr.msk.bf16.mxu1 %vm992_vm3, %v823_v54 }
 0x118   :  { %v359_v12 = vadd.f32 %v358_v11, %v357_v10 }
 0x11a   :  { %839 = vrsqrt.f32 %v359_v12 }
 0x11e   :  { %828 = vmatpush3.bf16.xpose.msk.msra.mxu1 %vm992_vm3, %v823_v54 }
 0x11f   :  { %831 = vmatprep.subr.msk.bf16.mxu1 %vm992_vm3, %v829_v1 }
 0x124   :  { %v840_v18 = vpop.eup %839 }
 0x125   :  { %v362_v19 = vmul.f32 %v840_v18, %v360_v15 }
 0x126   :  { %834 = vmatpush3.bf16.xpose.msk.msra.mxu1 %vm992_vm3, %v829_v1 }
 0x127   :  { %v375_v23 = vrot.slane %v362_v19, %v374_v17 }
 0x129   :  { %v377_v25 = vmul.f32 %v651_v20, %v375_v23  ;;  %v378_v26 = vmul.f32 %v652_v22, %v375_v23  ;;  %v379_v28 = vmul.f32 %v655_v24, %v375_v23  ;;  %v380_v29 = vmul.f32 %v656_v27, %v375_v23 }
 0x12b   :  { %769 = vmatprep.mubr.msk.f32.mxu1 %vm322_vm2, %v377_v25 }
 0x12d   :  { %770 = vmatmul.mubr.msk.f32.vlgmr.msra.gmra.mrb[0].mxu1 %vm322_vm2, %v378_v26 }
 0x12e   :  { %772 = vmatprep.mubr.msk.f32.mxu1 %vm322_vm2, %v379_v28 }
 0x131   :  { %773 = vmatmul.mubr.msk.f32.gmra.mrb[2].mxu1 %vm322_vm2, %v380_v29 }
 0x200   :  { %v771_v30 = vpop.f32.mrb[0].mxu1 }
 0x201   :  { %v507_v31 = vpop.f32.mrb[1].mxu1  ;;  %v553_v32 = vadd.f32 %v771_v30, %v616_v34 }
 0x202   :  { %v552_v33 = vadd.f32 %v616_v34, %v507_v31 }
 0x203   :  { %557 = vst [vmem:[#allocation2 + $0x8] sm:$0xff] %v553_v32 }
 0x204   :  { %v774_v35 = vpop.f32.mrb[2].mxu1  ;;  %556 = vst [vmem:[#allocation2] sm:$0xff] %v552_v33 }
 0x205   :  { %v517_v36 = vpop.f32.mrb[3].mxu1  ;;  %v555_v37 = vadd.f32 %v774_v35, %v616_v34 }
 0x206   :  { %v554_v38 = vadd.f32 %v616_v34, %v517_v36 }
 0x207   :  { %559 = vst [vmem:[#allocation2 + $0x18] sm:$0xff] %v555_v37 }
 0x208   :  { %558 = vst [vmem:[#allocation2 + $0x10] sm:$0xff] %v554_v38 }
 0x209   :  { %852 = shalt.err (!%p849_p4)
}
 0x20a   :  { %s853_s1 = scalar_lea.hbm %s1093_s6, 512 }
 0x20b   :  { %p854_p5 = scmp.ne.s32.totalorder %s1093_s6, %s853_s1  ;;  %p857_p6 = scmp.lt.u32.totalorder %s853_s1, %s1093_s6 }
 0x20d   :  { %p859_p7 = pnand %p857_p6, %p854_p5 }
 0x20f   :  { %862 = shalt.err (!%p859_p7)
}
 0x210   :  { %s866_s3 = smov 128   ;;  %s867_s15 = smov 8  }
 0x211   :  { %571 = dma.vmem_to_hbm [thread:$0]  %s566_s8, 512, %s1093_s6, [#allocation3], %s866_s3, %s866_s3, %s867_s15  }
 0x212   :  { %863 = dma.done.wait [#allocation3], 512  }
 0x213   :  { %864 = vsyncadd [#allocation3], 4294966784 }
 0x214   :  { %575 = vsyncpa [#allocation3], 1 }

</bundles_post_ra>
